<compile_context>
chip_gen: v7x
topology: tpu7x:2x2x1
jax: 0.10.0
libtpu: 0.0.40
codegen_flags: <defaults>
</compile_context>

<pallas_src>
import functools

import numpy as np
import jax
import jax.numpy as jnp
from jax.experimental import pallas as pl
from jax.experimental.pallas import tpu as pltpu


def _ceil_to(x, m):
    return ((x + m - 1) // m) * m


def _source_coords(in_size, out_size):
    """PyTorch trilinear (align_corners=False) source index / blend tables."""
    scale = in_size / out_size
    dst = np.arange(out_size, dtype=np.float32)
    src = np.maximum((dst + 0.5) * scale - 0.5, 0.0).astype(np.float32)
    lo = np.minimum(np.floor(src).astype(np.int32), in_size - 1)
    hi = np.minimum(lo + 1, in_size - 1)
    frac = (src - lo.astype(np.float32)).astype(np.float32)
    return lo, hi, frac


def _interp_matrix(in_size, out_size):
    """Dense (out_size, in_size) 1-D linear interpolation matrix (<=2 nonzeros/row)."""
    lo, hi, frac = _source_coords(in_size, out_size)
    w = np.zeros((out_size, in_size), np.float32)
    w[np.arange(out_size), lo] += 1.0 - frac
    w[np.arange(out_size), hi] += frac
    return w


def _make_kernel(Di, Do, d_lo, d_hi, d_frac):
    d_lo = [int(v) for v in d_lo]
    d_hi = [int(v) for v in d_hi]
    d_frac = [float(v) for v in d_frac]

    def kernel(x_ref, k_ref, o_ref):
        # x_ref : (TB, Di, Hi*Wi*2)  -- whole depth column of TB planes, fetched once
        # k_ref : (Hi*Wi*2, Ho*Wo*2) -- fused H+W (+ interleaved re/im) interp matrix^T
        # o_ref : (TB, Do*Ho*Wo*2)   -- lane-flat output slab (single dense store)
        k = k_ref[...]
        # Load each input depth slice exactly once; reused by every output depth.
        planes = [x_ref[:, d, :] for d in range(Di)]               # each (TB, Hi*Wi*2)
        outs = []
        for D in range(Do):                                        # Do is small & static
            lo, hi, f = d_lo[D], d_hi[D], d_frac[D]
            if lo == hi or f == 0.0:
                xd = planes[lo]                                    # exact edge / integer src
            else:
                xd = (1.0 - f) * planes[lo] + f * planes[hi]       # depth blend (VPU)
            # fused H/W (and complex-pair) interpolation on the MXU, rows = TB
            outs.append(jnp.dot(xd, k, preferred_element_type=jnp.float32))
        o_ref[...] = jnp.concatenate(outs, axis=-1).astype(o_ref.dtype)

    return kernel


def _vmem_limit_bytes():
    """Scoped-VMEM limit that is safe on v5e/v6e (128 MiB) and v7x (64 MiB)."""
    try:
        cap = int(pltpu.get_tpu_info().vmem_capacity_bytes)
    except Exception:
        cap = 64 * 1024 * 1024          # conservative: v7x per-core VMEM
    return min(cap // 2, 48 * 1024 * 1024)


def _choose_tb(B, in_plane_bytes, out_plane_bytes, fixed_bytes, budget):
    # 2x double-buffered input, 2x double-buffered output + ~2x output-sized temporaries.
    per_plane = 2 * in_plane_bytes + 4 * out_plane_bytes
    avail = max(budget - fixed_bytes, per_plane)
    tb = max(1, avail // per_plane)
    tb = int(min(tb, 256, B))           # 256 rows already saturate the MXU
    if B >= 8:
        tb = max(8, (tb // 8) * 8)      # keep out-block sublane dim a multiple of 8
    else:
        tb = B
    if tb >= B:
        if B >= 16:
            # keep >=2 parallel grid steps so both v7x TensorCores get work
            tb = min(B, _ceil_to((B + 1) // 2, 8))
        else:
            tb = B
    return tb


def trilinear_upsample_planes(planes, size, Hi, Wi):
    """planes: (B, Di, Hi*Wi*2) float32 -> (B, Do*Ho*Wo*2) float32 (trilinear, half-pixel)."""
    B, Di, in_lanes = planes.shape
    Do, Ho, Wo = size
    assert in_lanes == Hi * Wi * 2

    # Fused H/W interpolation matrix carrying the interleaved (re, im) pair along:
    #   K = kron(Wh, kron(Ww, I2)) : (Ho*Wo*2, Hi*Wi*2);  the kernel uses K^T.
    wh = _interp_matrix(Hi, Ho)
    ww = _interp_matrix(Wi, Wo)
    k_t = np.kron(wh, np.kron(ww, np.eye(2, dtype=np.float32))).T
    k_t = np.ascontiguousarray(k_t, dtype=np.float32)              # (Hi*Wi*2, Ho*Wo*2)

    d_lo, d_hi, d_frac = _source_coords(Di, Do)                    # static depth tables
    out_lanes = Do * Ho * Wo * 2

    # Size the batch-of-planes tile against the per-generation VMEM budget.
    vmem_limit = _vmem_limit_bytes()
    tile_budget = int(vmem_limit * 0.75)
    in_plane_b = _ceil_to(Di, 8) * _ceil_to(in_lanes, 128) * 4     # padded VMEM footprint
    out_plane_b = _ceil_to(out_lanes, 128) * 4
    fixed_b = 2 * _ceil_to(k_t.shape[0], 8) * _ceil_to(k_t.shape[1], 128) * 4
    tb = _choose_tb(B, in_plane_b, out_plane_b, fixed_b, tile_budget)
    nb = pl.cdiv(B, tb)

    kernel = _make_kernel(Di, Do, d_lo, d_hi, d_frac)

    grid_spec = pltpu.PrefetchScalarGridSpec(
        num_scalar_prefetch=0,
        grid=(nb,),
        in_specs=[
            # one big block per step: TB planes x full depth column (read exactly once)
            pl.BlockSpec((tb, Di, in_lanes), lambda b: (b, 0, 0)),
            # interpolation matrix, resident every step
            pl.BlockSpec((k_t.shape[0], k_t.shape[1]), lambda b: (0, 0)),
        ],
        out_specs=pl.BlockSpec((tb, out_lanes), lambda b: (b, 0)),
    )

    return pl.pallas_call(
        kernel,
        out_shape=jax.ShapeDtypeStruct((B, out_lanes), jnp.float32),
        grid_spec=grid_spec,
        compiler_params=pltpu.CompilerParams(
            dimension_semantics=("parallel",),
            vmem_limit_bytes=int(vmem_limit),
        ),
    )(planes, jnp.asarray(k_t))


@functools.partial(jax.jit, static_argnames=("size",))
def complex_upsample3d(x, size):
    """x: complex64 (N, C, D, H, W) -> complex64 (N, C, *size). Mirrors ComplexUpsample3d."""
    if size is None:
        raise ValueError("ComplexUpsample3d: `size` must be given (nn.Upsample(size=None) "
                         "has no valid forward without scale_factor).")
    N, C, Di, Hi, Wi = x.shape
    Do, Ho, Wo = size
    # Interleave (re, im) innermost (single fused pass under jit) and fold it into W so the
    # kernel works on plain float32 planes with lane-dense rows and B = N*C (not 2*N*C).
    planes = jnp.stack([jnp.real(x), jnp.imag(x)], axis=-1).astype(jnp.float32)
    planes = planes.reshape(N * C, Di, Hi * Wi * 2)
    up = trilinear_upsample_planes(planes, (Do, Ho, Wo), Hi, Wi)       # (N*C, Do*Ho*Wo*2)
    up = up.reshape(N, C, Do, Ho, Wo, 2)
    return jax.lax.complex(up[..., 0], up[..., 1])


def _reference(x_np, size):
    """Pure numpy reference with identical PyTorch-style trilinear weights."""
    _, _, Di, Hi, Wi = x_np.shape
    Do, Ho, Wo = size
    wd = _interp_matrix(Di, Do)
    wh = _interp_matrix(Hi, Ho)
    ww = _interp_matrix(Wi, Wo)

    def up(r):
        return np.einsum('Dd,Hh,Ww,ncdhw->ncDHW', wd, wh, ww, r, optimize=True)

    return up(x_np.real) + 1j * up(x_np.imag)


if __name__ == "__main__":
    key = jax.random.PRNGKey(0)
    kr, ki = jax.random.split(key)

    N, C, Di, Hi, Wi = 2, 3, 4, 6, 8
    size = (8, 12, 16)   # nn.Upsample(size=size, mode='trilinear')

    xr = jax.random.normal(kr, (N, C, Di, Hi, Wi), dtype=jnp.float32)
    xi = jax.random.normal(ki, (N, C, Di, Hi, Wi), dtype=jnp.float32)
    x = (xr + 1j * xi).astype(jnp.complex64)

    out = complex_upsample3d(x, size)
    out = jax.block_until_ready(out)

    assert out.shape == (N, C) + size and out.dtype == jnp.complex64
    ref = _reference(np.asarray(x), size)
    np.testing.assert_allclose(np.asarray(out), ref, rtol=1e-4, atol=1e-4)

    print("KERNEL_OK")
</pallas_src>

<mosaic_0001>
module attributes {stable_mosaic.version = 11 : i64} {
  func.func @kernel(%arg0: i32, %arg1: memref<6x4x96xf32, #tpu.memory_space<vmem>>, %arg2: memref<96x384xf32, #tpu.memory_space<vmem>>, %arg3: memref<6x3072xf32, #tpu.memory_space<vmem>>) attributes {dimension_semantics = [#tpu.dimension_semantics<parallel>], iteration_bounds = array<i64: 1>, scalar_prefetch = 0 : i64, scratch_operands = 0 : i64, tpu.core_type = #tpu.core_type<tc>, window_params = [{transform_indices = @transform_0, window_bounds = array<i64: 6, 4, 96>}, {pipeline_mode = #tpu.pipeline_mode<synchronous>, transform_indices = @transform_1, window_bounds = array<i64: 96, 384>}, {transform_indices = @transform_2, window_bounds = array<i64: 6, 3072>}]} {
    %c0 = arith.constant 0 : index
    %c0_0 = arith.constant 0 : index
    %0 = vector.load %arg2[%c0, %c0_0] : memref<96x384xf32, #tpu.memory_space<vmem>>, vector<96x384xf32>
    %c0_1 = arith.constant 0 : index
    %c0_2 = arith.constant 0 : index
    %c0_3 = arith.constant 0 : index
    %1 = vector.load %arg1[%c0_1, %c0_2, %c0_3] : memref<6x4x96xf32, #tpu.memory_space<vmem>>, vector<6x1x96xf32>
    %2 = vector.shape_cast %1 : vector<6x1x96xf32> to vector<6x96xf32>
    %c0_4 = arith.constant 0 : index
    %c1 = arith.constant 1 : index
    %c0_5 = arith.constant 0 : index
    %3 = vector.load %arg1[%c0_4, %c1, %c0_5] : memref<6x4x96xf32, #tpu.memory_space<vmem>>, vector<6x1x96xf32>
    %4 = vector.shape_cast %3 : vector<6x1x96xf32> to vector<6x96xf32>
    %c0_6 = arith.constant 0 : index
    %c2 = arith.constant 2 : index
    %c0_7 = arith.constant 0 : index
    %5 = vector.load %arg1[%c0_6, %c2, %c0_7] : memref<6x4x96xf32, #tpu.memory_space<vmem>>, vector<6x1x96xf32>
    %6 = vector.shape_cast %5 : vector<6x1x96xf32> to vector<6x96xf32>
    %c0_8 = arith.constant 0 : index
    %c3 = arith.constant 3 : index
    %c0_9 = arith.constant 0 : index
    %7 = vector.load %arg1[%c0_8, %c3, %c0_9] : memref<6x4x96xf32, #tpu.memory_space<vmem>>, vector<6x1x96xf32>
    %8 = vector.shape_cast %7 : vector<6x1x96xf32> to vector<6x96xf32>
    %cst = arith.constant dense<0.000000e+00> : vector<6x384xf32>
    %9 = tpu.matmul %2, %0, %cst {dimension_numbers = #tpu.dot_dimension_numbers<[1], [0], [0], [1], [0, 0, 1, 1], [], []>} : vector<6x96xf32>, vector<96x384xf32>, vector<6x384xf32> -> vector<6x384xf32>
    %cst_10 = arith.constant 7.500000e-01 : f32
    %10 = vector.broadcast %cst_10 : f32 to vector<6x96xf32>
    %11 = arith.mulf %10, %2 : vector<6x96xf32>
    %cst_11 = arith.constant 2.500000e-01 : f32
    %12 = vector.broadcast %cst_11 : f32 to vector<6x96xf32>
    %13 = arith.mulf %12, %4 : vector<6x96xf32>
    %14 = arith.addf %11, %13 : vector<6x96xf32>
    %cst_12 = arith.constant dense<0.000000e+00> : vector<6x384xf32>
    %15 = tpu.matmul %14, %0, %cst_12 {dimension_numbers = #tpu.dot_dimension_numbers<[1], [0], [0], [1], [0, 0, 1, 1], [], []>} : vector<6x96xf32>, vector<96x384xf32>, vector<6x384xf32> -> vector<6x384xf32>
    %cst_13 = arith.constant 2.500000e-01 : f32
    %16 = vector.broadcast %cst_13 : f32 to vector<6x96xf32>
    %17 = arith.mulf %16, %2 : vector<6x96xf32>
    %cst_14 = arith.constant 7.500000e-01 : f32
    %18 = vector.broadcast %cst_14 : f32 to vector<6x96xf32>
    %19 = arith.mulf %18, %4 : vector<6x96xf32>
    %20 = arith.addf %17, %19 : vector<6x96xf32>
    %cst_15 = arith.constant dense<0.000000e+00> : vector<6x384xf32>
    %21 = tpu.matmul %20, %0, %cst_15 {dimension_numbers = #tpu.dot_dimension_numbers<[1], [0], [0], [1], [0, 0, 1, 1], [], []>} : vector<6x96xf32>, vector<96x384xf32>, vector<6x384xf32> -> vector<6x384xf32>
    %cst_16 = arith.constant 7.500000e-01 : f32
    %22 = vector.broadcast %cst_16 : f32 to vector<6x96xf32>
    %23 = arith.mulf %22, %4 : vector<6x96xf32>
    %cst_17 = arith.constant 2.500000e-01 : f32
    %24 = vector.broadcast %cst_17 : f32 to vector<6x96xf32>
    %25 = arith.mulf %24, %6 : vector<6x96xf32>
    %26 = arith.addf %23, %25 : vector<6x96xf32>
    %cst_18 = arith.constant dense<0.000000e+00> : vector<6x384xf32>
    %27 = tpu.matmul %26, %0, %cst_18 {dimension_numbers = #tpu.dot_dimension_numbers<[1], [0], [0], [1], [0, 0, 1, 1], [], []>} : vector<6x96xf32>, vector<96x384xf32>, vector<6x384xf32> -> vector<6x384xf32>
    %cst_19 = arith.constant 2.500000e-01 : f32
    %28 = vector.broadcast %cst_19 : f32 to vector<6x96xf32>
    %29 = arith.mulf %28, %4 : vector<6x96xf32>
    %cst_20 = arith.constant 7.500000e-01 : f32
    %30 = vector.broadcast %cst_20 : f32 to vector<6x96xf32>
    %31 = arith.mulf %30, %6 : vector<6x96xf32>
    %32 = arith.addf %29, %31 : vector<6x96xf32>
    %cst_21 = arith.constant dense<0.000000e+00> : vector<6x384xf32>
    %33 = tpu.matmul %32, %0, %cst_21 {dimension_numbers = #tpu.dot_dimension_numbers<[1], [0], [0], [1], [0, 0, 1, 1], [], []>} : vector<6x96xf32>, vector<96x384xf32>, vector<6x384xf32> -> vector<6x384xf32>
    %cst_22 = arith.constant 7.500000e-01 : f32
    %34 = vector.broadcast %cst_22 : f32 to vector<6x96xf32>
    %35 = arith.mulf %34, %6 : vector<6x96xf32>
    %cst_23 = arith.constant 2.500000e-01 : f32
    %36 = vector.broadcast %cst_23 : f32 to vector<6x96xf32>
    %37 = arith.mulf %36, %8 : vector<6x96xf32>
    %38 = arith.addf %35, %37 : vector<6x96xf32>
    %cst_24 = arith.constant dense<0.000000e+00> : vector<6x384xf32>
    %39 = tpu.matmul %38, %0, %cst_24 {dimension_numbers = #tpu.dot_dimension_numbers<[1], [0], [0], [1], [0, 0, 1, 1], [], []>} : vector<6x96xf32>, vector<96x384xf32>, vector<6x384xf32> -> vector<6x384xf32>
    %cst_25 = arith.constant 2.500000e-01 : f32
    %40 = vector.broadcast %cst_25 : f32 to vector<6x96xf32>
    %41 = arith.mulf %40, %6 : vector<6x96xf32>
    %cst_26 = arith.constant 7.500000e-01 : f32
    %42 = vector.broadcast %cst_26 : f32 to vector<6x96xf32>
    %43 = arith.mulf %42, %8 : vector<6x96xf32>
    %44 = arith.addf %41, %43 : vector<6x96xf32>
    %cst_27 = arith.constant dense<0.000000e+00> : vector<6x384xf32>
    %45 = tpu.matmul %44, %0, %cst_27 {dimension_numbers = #tpu.dot_dimension_numbers<[1], [0], [0], [1], [0, 0, 1, 1], [], []>} : vector<6x96xf32>, vector<96x384xf32>, vector<6x384xf32> -> vector<6x384xf32>
    %cst_28 = arith.constant dense<0.000000e+00> : vector<6x384xf32>
    %46 = tpu.matmul %8, %0, %cst_28 {dimension_numbers = #tpu.dot_dimension_numbers<[1], [0], [0], [1], [0, 0, 1, 1], [], []>} : vector<6x96xf32>, vector<96x384xf32>, vector<6x384xf32> -> vector<6x384xf32>
    %47 = tpu.concatenate %9, %15, %21, %27, %33, %39, %45, %46 in 1 : vector<6x384xf32>, vector<6x384xf32>, vector<6x384xf32>, vector<6x384xf32>, vector<6x384xf32>, vector<6x384xf32>, vector<6x384xf32>, vector<6x384xf32> -> vector<6x3072xf32>
    %c0_29 = arith.constant 0 : index
    %c0_30 = arith.constant 0 : index
    %48 = vector.load %arg3[%c0_29, %c0_30] : memref<6x3072xf32, #tpu.memory_space<vmem>>, vector<6x3072xf32>
    tpu.vector_store %arg3[%c0_29, %c0_30], %47 {strides = array<i32>} : memref<6x3072xf32, #tpu.memory_space<vmem>>, vector<6x3072xf32>,
    return
  }
  func.func @transform_0(%arg0: i32) -> (i32, i32, i32) {
    %c0_i32 = arith.constant 0 : i32
    %c0_i32_0 = arith.constant 0 : i32
    %c0_i32_1 = arith.constant 0 : i32
    return %arg0, %c0_i32, %c0_i32_0 : i32, i32, i32
  }
  func.func @transform_1(%arg0: i32) -> (i32, i32) {
    %c0_i32 = arith.constant 0 : i32
    %c0_i32_0 = arith.constant 0 : i32
    %c0_i32_1 = arith.constant 0 : i32
    return %c0_i32, %c0_i32_0 : i32, i32
  }
  func.func @transform_2(%arg0: i32) -> (i32, i32) {
    %c0_i32 = arith.constant 0 : i32
    %c0_i32_0 = arith.constant 0 : i32
    return %arg0, %c0_i32 : i32, i32
  }
}

</mosaic_0001>

<bundles_post_ra>
// kernel: custom-call
= control target key start
LH: loop header
LB: loop body
LE: loop exit
PB: predicated region body
PF: predicated region fallthrough
CT: control target
= control target key end

     0   :  { %2 = vsyncpa [#allocation0], 0  ;;  %s61_s0 = inlined_call_operand.hbm [shape: c64[2,3,4,6,8], index: 0, kind: input, shape index: {}]   ;;  %s62_s1 = inlined_call_operand.vmem [shape: f32[2,3,4,6,8], index: 1, kind: output, shape index: {}]  }
   0x1   :  { %s3_s8 = sshll.u32 %s62_s1, 4  ;;  %s9_s11 = scalar_lea.hbm %s61_s0, 2304  ;;  %s4_s8 = int_to_ptr.vmem [resolvable:$true] %s3_s8 }
   0x2   :  { %p10_p0 = scmp.ne.s32.totalorder %s61_s0, %s9_s11  ;;  %s11_s16 = scalar_lea.hbm %s61_s0, 4608 }
   0x3   :  { %p12_p1 = scmp.lt.u32.totalorder %s11_s16, %s9_s11  ;;  %p13_p2 = scmp.lt.u32.totalorder %s9_s11, %s61_s0 }
   0x5   :  { %p14_p3 = por %p13_p2, %p12_p1 }
   0x7   :  { %p15_p4 = pnand %p14_p3, %p10_p0 }
   0x9   :  { %18 = shalt.err (!%p15_p4)  }
   0xa   :  { %s19_s1 = scalar_lea.vmem %s4_s8, 2304  ;;  %p24_p6 = scmp.lt.s32.totalorder %s4_s8, %s4_s8 }
   0xb   :  { %p20_p5 = scmp.ne.s32.totalorder %s4_s8, %s19_s1  ;;  %p25_p7 = scmp.lt.s32.totalorder %s19_s1, %s19_s1 }
   0xd   :  { %p26_p8 = por %p25_p7, %p24_p6 }
   0xf   :  { %p27_p9 = pnand %p26_p8, %p20_p5 }
  0x11   :  { %30 = shalt.err (!%p27_p9)  }
  0x12   :  { %6 = dma.hbm_to_vmem [thread:$0]  %s61_s0, 2304, %s4_s8, [#allocation0] }
  0x13   :  { %31 = dma.done.wait [#allocation0], 2304  }
  0x14   :  { %32 = vsyncadd [#allocation0], 4294964992 }
  0x15   :  { %8 = vsyncpa [#allocation0], 1 }

// kernel: custom-call.1
= control target key start
LH: loop header
LB: loop body
LE: loop exit
PB: predicated region body
PF: predicated region fallthrough
CT: control target
= control target key end

     0   :  { %s59_s0 = inlined_call_operand.hbm [shape: c64[2,3,4,6,8], index: 0, kind: input, shape index: {}]   ;;  %s60_s1 = inlined_call_operand.vmem [shape: f32[2,3,4,6,8], index: 1, kind: output, shape index: {}]  }
   0x1   :  { %s2_s8 = scalar_lea.hbm %s59_s0, 2304 }
   0x2   :  { %3 = vsyncpa [#allocation0], 0  ;;  %s4_s11 = sshll.u32 %s60_s1, 4  ;;  %s34_s14 = scalar_lea.hbm %s59_s0, 4608  ;;  %s5_s11 = int_to_ptr.vmem [resolvable:$true] %s4_s11 }
   0x3   :  { %p11_p0 = scmp.ne.s32.totalorder %s2_s8, %s34_s14  ;;  %p13_p1 = scmp.lt.u32.totalorder %s2_s8, %s59_s0 }
   0x4   :  { %p14_p2 = scmp.lt.u32.totalorder %s34_s14, %s34_s14  ;;  %p16_p4 = scmp.lt.u32.totalorder %s34_s14, %s2_s8 }
   0x6   :  { %p15_p3 = por %p14_p2, %p13_p1 }
   0x8   :  { %p17_p5 = por %p16_p4, %p15_p3 }
   0xa   :  { %p18_p6 = pnand %p17_p5, %p11_p0 }
   0xc   :  { %21 = shalt.err (!%p18_p6)  }
   0xd   :  { %s22_s17 = scalar_lea.vmem %s5_s11, 2304  ;;  %p27_p8 = scmp.lt.s32.totalorder %s5_s11, %s5_s11 }
   0xe   :  { %p23_p7 = scmp.ne.s32.totalorder %s5_s11, %s22_s17  ;;  %p28_p9 = scmp.lt.s32.totalorder %s22_s17, %s22_s17 }
  0x10   :  { %p29_p10 = por %p28_p9, %p27_p8 }
  0x12   :  { %p30_p11 = pnand %p29_p10, %p23_p7 }
  0x14   :  { %33 = shalt.err (!%p30_p11)  }
  0x15   :  { %7 = dma.hbm_to_vmem [thread:$0]  %s2_s8, 2304, %s5_s11, [#allocation0] }
  0x16   :  { %35 = dma.done.wait [#allocation0], 2304  }
  0x17   :  { %36 = vsyncadd [#allocation0], 4294964992 }
  0x18   :  { %9 = vsyncpa [#allocation0], 1 }

// kernel: complex_upsample3d.1
= control target key start
LH: loop header
LB: loop body
LE: loop exit
PB: predicated region body
PF: predicated region fallthrough
CT: control target
= control target key end

     0   :  { %7 = vsyncpa [#allocation3], 0  ;;  %s2178_s9 = smov [#allocation2]   ;;  %s2823_s0 = inlined_call_operand.vmem [shape: f32[6,4,96], index: 0, kind: input, shape index: {}]   ;;  %s2824_s1 = inlined_call_operand.hbm [shape: f32[96,384], index: 1, kind: input, shape index: {}]   ;;  %s2825_s2 = inlined_call_operand.vmem [shape: f32[6,3072], index: 2, kind: output, shape index: {}]  }
   0x1   :  { %s15_s10 = sshll.u32 %s2178_s9, 4  ;;  %s2154_s13 = scalar_lea.hbm %s2824_s1, 4608  ;;  %s16_s10 = int_to_ptr.vmem [resolvable:$true] %s15_s10 }
   0x2   :  { %p2155_p0 = scmp.ne.s32.totalorder %s2824_s1, %s2154_s13  ;;  %p2158_p1 = scmp.lt.u32.totalorder %s2154_s13, %s2824_s1 }
   0x4   :  { %p2160_p2 = pnand %p2158_p1, %p2155_p0 }
   0x6   :  { %2163 = shalt.err (!%p2160_p2)
}
   0x7   :  { %s2164_s18 = scalar_lea.vmem %s16_s10, 4608  ;;  %p2169_p4 = scmp.lt.s32.totalorder %s16_s10, %s16_s10 }
   0x8   :  { %p2165_p3 = scmp.ne.s32.totalorder %s16_s10, %s2164_s18  ;;  %p2170_p5 = scmp.lt.s32.totalorder %s2164_s18, %s2164_s18 }
   0xa   :  { %p2171_p6 = por %p2170_p5, %p2169_p4 }
   0xc   :  { %p2172_p7 = pnand %p2171_p6, %p2165_p3 }
   0xe   :  { %2175 = shalt.err (!%p2172_p7)
}
   0xf   :  { %s2179_s19 = smov 384   ;;  %s2180_s20 = smov 24  }
  0x10   :  { %21 = dma.hbm_to_vmem [thread:$0]  %s2824_s1, 4608, %s16_s10, [#allocation3], %s2179_s19, %s2179_s19, %s2180_s20  }
  0x11   :  { %2176 = dma.done.wait [#allocation3], 4608  }
  0x12   :  { %2177 = vsyncadd [#allocation3], 4294962688  ;;  %v2828_v0 = vmov 0.0|0.0   ;;  %v2826_v1 = vmov 0.0   ;;  %vm2183_vm0 = vmmov 0   ;;  %v26_v2 = vld [vmem:[#allocation2 + $0x8] sm:$0xff] }
  0x13   :  { %1836 = vmatprep.subr.bf16.mxu1 %v2828_v0  ;;  %173 = vmatprep.mubr.f32.mxu0 %v2826_v1  ;;  %v29_v3 = vld [vmem:[#allocation2 + $0x20] sm:$0xff]  ;;  %v28_v6 = vld [vmem:[#allocation2 + $0x18] sm:$0xff]  ;;  %v27_v7 = vld [vmem:[#allocation2 + $0x10] sm:$0xff]  ;;  %vm92_vm1 = vcmask 1041409   ;;  %vm95_vm2 = vcmask 1042434   ;;  %vm98_vm3 = vcmask 1043459  }
  0x14   :  { %1620 = vmatprep.mubr.msk.f32.mxu1 %vm2183_vm0, %v2826_v1  ;;  %v25_v4 = vld [vmem:[#allocation2] sm:$0xff]  ;;  %v2215_v5 = vpack.c.bf16 %v29_v3, %v26_v2  ;;  %v30_v8 = vld [vmem:[#allocation2 + $0x28] sm:$0xff]  ;;  %v32_v11 = vld [vmem:[#allocation2 + $0x38] sm:$0xff]  ;;  %vm101_vm4 = vcmask 1044484   ;;  %vm104_vm5 = vcmask 1045509   ;;  %vm106_vm6 = vcmask 785408  }
  0x15   :  { %v2217_v9 = vpack.c.bf16 %v28_v6, %v25_v4  ;;  %v2219_v10 = vpack.c.bf16 %v30_v8, %v27_v7  ;;  %v35_v12 = vld [vmem:[#allocation2 + $0x50] sm:$0xff]  ;;  %v34_v15 = vld [vmem:[#allocation2 + $0x48] sm:$0xff]  ;;  %v33_v16 = vld [vmem:[#allocation2 + $0x40] sm:$0xff] }
  0x16   :  { %v31_v13 = vld [vmem:[#allocation2 + $0x30] sm:$0xff]  ;;  %1813 = vmatprep.subr.bf16.mxu0 %v2215_v5  ;;  %v2222_v14 = vpack.c.bf16 %v35_v12, %v32_v11  ;;  %v36_v17 = vld [vmem:[#allocation2 + $0x58] sm:$0xff]  ;;  %v38_v20 = vld [vmem:[#allocation2 + $0x68] sm:$0xff] }
  0x17   :  { %1815 = vmatpush1.bf16.msra.mxu0 %v2217_v9  ;;  %1838 = vmatpush3.bf16.msra.mxu1 %v2219_v10  ;;  %v2226_v18 = vpack.c.bf16 %v34_v15, %v31_v13  ;;  %v2228_v19 = vpack.c.bf16 %v36_v17, %v33_v16  ;;  %v41_v21 = vld [vmem:[#allocation2 + $0x80] sm:$0xff]  ;;  %v40_v24 = vld [vmem:[#allocation2 + $0x78] sm:$0xff]  ;;  %v39_v25 = vld [vmem:[#allocation2 + $0x70] sm:$0xff] }
  0x18   :  { %v37_v22 = vld [vmem:[#allocation2 + $0x60] sm:$0xff]  ;;  %1817 = vmatprep.subr.bf16.mxu0 %v2222_v14  ;;  %1839 = vmatprep.subr.bf16.mxu1 %v2828_v0  ;;  %v2232_v23 = vpack.c.bf16 %v41_v21, %v38_v20  ;;  %v42_v26 = vld [vmem:[#allocation2 + $0x88] sm:$0xff]  ;;  %v44_v27 = vld [vmem:[#allocation2 + $0x98] sm:$0xff] }
  0x19   :  { %v47_v28 = vld [vmem:[#allocation2 + $0xb0] sm:$0xff]  ;;  %v2236_v29 = vpack.c.bf16 %v40_v24, %v37_v22  ;;  %v2238_v30 = vpack.c.bf16 %v42_v26, %v39_v25  ;;  %v46_v33 = vld [vmem:[#allocation2 + $0xa8] sm:$0xff]  ;;  %v45_v34 = vld [vmem:[#allocation2 + $0xa0] sm:$0xff] }
  0x1a   :  { %v43_v31 = vld [vmem:[#allocation2 + $0x90] sm:$0xff]  ;;  %v2242_v32 = vpack.c.bf16 %v47_v28, %v44_v27  ;;  %v48_v35 = vld [vmem:[#allocation2 + $0xb8] sm:$0xff]  ;;  %v50_v36 = vld [vmem:[#allocation2 + $0xc8] sm:$0xff] }
  0x1b   :  { %1819 = vmatpush1.bf16.msra.mxu0 %v2226_v18  ;;  %1841 = vmatpush3.bf16.msra.mxu1 %v2228_v19  ;;  %2846 = vst [vmem:[#allocation5_spill] sm:$0xff] %v2236_v29  ;;  %2847 = vst [vmem:[#allocation6_spill] sm:$0xff] %v2238_v30  ;;  %v53_v37 = vld [vmem:[#allocation2 + $0xe0] sm:$0xff]  ;;  %v52_v39 = vld [vmem:[#allocation2 + $0xd8] sm:$0xff]  ;;  %v2246_v41 = vpack.c.bf16 %v46_v33, %v43_v31  ;;  %v2248_v42 = vpack.c.bf16 %v48_v35, %v45_v34 }
  0x1c   :  { %1821 = vmatprep.subr.bf16.mxu0 %v2232_v23  ;;  %1842 = vmatprep.subr.bf16.mxu1 %v2828_v0  ;;  %2848 = vst [vmem:[#allocation7_spill] sm:$0xff] %v2242_v32  ;;  %v49_v38 = vld [vmem:[#allocation2 + $0xc0] sm:$0xff]  ;;  %v51_v40 = vld [vmem:[#allocation2 + $0xd0] sm:$0xff]  ;;  %v54_v43 = vld [vmem:[#allocation2 + $0xe8] sm:$0xff]  ;;  %v2262_v46 = vpack.c.bf16 %v53_v37, %v50_v36 }
  0x1d   :  { %2849 = vst [vmem:[#allocation8_spill] sm:$0xff] %v2246_v41  ;;  %2850 = vst [vmem:[#allocation9_spill] sm:$0xff] %v2248_v42  ;;  %v2253_v44 = vld [vmem:[%s2823_s0 + $0x4] sm:$0x1]  ;;  %v2258_v45 = vld [vmem:[%s2823_s0 + $0x8] sm:$0x1]  ;;  %v2282_v56 = vpack.c.bf16 %v52_v39, %v49_v38  ;;  %v2284_v57 = vpack.c.bf16 %v54_v43, %v51_v40 }
  0x1e   :  { %2851 = vst [vmem:[#allocation10_spill] sm:$0xff] %v2262_v46  ;;  %v2267_v47 = vld [vmem:[%s2823_s0] sm:$0x1]  ;;  %v2272_v48 = vld [vmem:[%s2823_s0 + $0xc] sm:$0x1]  ;;  %v56_v50 = vld [vmem:[#allocation2 + $0xf8] sm:$0xff] }
  0x1f   :  { %1823 = vmatpush1.bf16.msra.mxu0 %v2236_v29  ;;  %1844 = vmatpush3.bf16.msra.mxu1 %v2238_v30  ;;  %v2277_v49 = vld [vmem:[%s2823_s0 + $0x10] sm:$0x1]  ;;  %v91_v53 = vrot.slane %v2253_v44, 7  ;;  %v94_v54 = vrot.slane %v2258_v45, 6  ;;  %v97_v55 = vrot.slane %v2272_v48, 5  ;;  %v58_v58 = vld [vmem:[#allocation2 + $0x108] sm:$0xff] }
  0x20   :  { %1825 = vmatprep.subr.bf16.mxu0 %v2242_v32  ;;  %1845 = vmatprep.subr.bf16.mxu1 %v2828_v0  ;;  %v59_v51 = vld [vmem:[#allocation2 + $0x110] sm:$0xff]  ;;  %v57_v59 = vld [vmem:[#allocation2 + $0x100] sm:$0xff]  ;;  %v60_v61 = vld [vmem:[#allocation2 + $0x118] sm:$0xff]  ;;  %v100_v2 = vrot.slane %v2277_v49, 4  ;;  %v250_v3 = vmul.f32 0.75, %v2267_v47  ;;  %v251_v4 = vmul.f32 0.75, %v2253_v44 }
  0x21   :  { %v55_v52 = vld [vmem:[#allocation2 + $0xf0] sm:$0xff]  ;;  %v2289_v60 = vld [vmem:[%s2823_s0 + $0x1] sm:$0x1]  ;;  %v93_v63 = vsel %vm92_vm1, %v91_v53, %v2267_v47  ;;  %v2305_v6 = vpack.c.bf16 %v59_v51, %v56_v50  ;;  %v68_v8 = vld [vmem:[%s2823_s0 + $0x5] sm:$0x1]  ;;  %v252_v15 = vmul.f32 0.75, %v2258_v45  ;;  %v2328_v22 = vpack.c.bf16 %v60_v61, %v57_v59 }
  0x22   :  { %v2296_v62 = vld [vmem:[%s2823_s0 + $0x14] sm:$0x1]  ;;  %v96_v7 = vsel %vm95_vm2, %v94_v54, %v93_v63  ;;  %v69_v11 = vld [vmem:[%s2823_s0 + $0x9] sm:$0x1]  ;;  %v70_v12 = vld [vmem:[%s2823_s0 + $0xd] sm:$0x1]  ;;  %v2326_v21 = vpack.c.bf16 %v58_v58, %v55_v52 }
  0x23   :  { %1827 = vmatpush1.bf16.msra.mxu0 %v2246_v41  ;;  %1847 = vmatpush3.bf16.msra.mxu1 %v2248_v42  ;;  %2852 = vst [vmem:[#allocation11_spill] sm:$0xff] %v2296_v62  ;;  %v99_v13 = vsel %vm98_vm3, %v97_v55, %v96_v7  ;;  %v253_v16 = vmul.f32 0.75, %v2272_v48  ;;  %v2321_v17 = vmul.f32 0.25, %v2289_v60  ;;  %v71_v20 = vld [vmem:[%s2823_s0 + $0x11] sm:$0x1]  ;;  %v254_v24 = vmul.f32 0.75, %v2277_v49 }
  0x24   :  { %1829 = vmatprep.subr.bf16.mxu0 %v2262_v46  ;;  %1848 = vmatprep.subr.bf16.mxu1 %v2828_v0  ;;  %v72_v25 = vld [vmem:[%s2823_s0 + $0x15] sm:$0x1]  ;;  %v103_v26 = vrot.slane %v2296_v62, 3  ;;  %v2337_v27 = vmul.f32 0.25, %v68_v8  ;;  %v2339_v28 = vmul.f32 0.25, %v69_v11  ;;  %v2341_v31 = vmul.f32 0.25, %v70_v12 }
  0x25   :  { %v102_v33 = vsel %vm101_vm4, %v100_v2, %v99_v13  ;;  %v255_v34 = vmul.f32 0.75, %v2296_v62  ;;  %v2347_v35 = vmul.f32 0.25, %v71_v20  ;;  %v2349_v36 = vmul.f32 0.25, %v72_v25  ;;  %v73_v54 = vld [vmem:[%s2823_s0 + $0x2] sm:$0x1] }
  0x26   :  { %v262_v37 = vadd.f32 %v2321_v17, %v250_v3  ;;  %v263_v38 = vadd.f32 %v2337_v27, %v251_v4  ;;  %v264_v39 = vadd.f32 %v2339_v28, %v252_v15  ;;  %v265_v40 = vadd.f32 %v2341_v31, %v253_v16  ;;  %v74_v61 = vld [vmem:[%s2823_s0 + $0x6] sm:$0x1]  ;;  %v75_v63 = vld [vmem:[%s2823_s0 + $0xa] sm:$0x1]  ;;  %v76_v3 = vld [vmem:[%s2823_s0 + $0xe] sm:$0x1] }
  0x27   :  { %1831 = vmatpush1.bf16.msra.mxu0 %v2282_v56  ;;  %1850 = vmatpush3.bf16.msra.mxu1 %v2284_v57  ;;  %v266_v43 = vadd.f32 %v2347_v35, %v254_v24  ;;  %v105_v50 = vsel %vm104_vm5, %v103_v26, %v102_v33  ;;  %v267_v55 = vadd.f32 %v2349_v36, %v255_v34  ;;  %v77_v4 = vld [vmem:[%s2823_s0 + $0x12] sm:$0x1]  ;;  %v2381_v7 = vmul.f32 0.25, %v73_v54  ;;  %v78_v26 = vld [vmem:[%s2823_s0 + $0x16] sm:$0x1] }
  0x28   :  { %1833 = vmatprep.subr.bf16.mxu0 %v2305_v6  ;;  %1851 = vmatprep.subr.bf16.mxu1 %v2828_v0  ;;  %v274_v51 = vrot.slane %v263_v38, 7  ;;  %v276_v52 = vrot.slane %v264_v39, 6  ;;  %v278_v53 = vrot.slane %v265_v40, 5  ;;  %v2384_v13 = vmul.f32 0.75, %v2289_v60 }
  0x29   :  { %v280_v59 = vrot.slane %v266_v43, 4  ;;  %v2389_v16 = vmul.f32 0.75, %v68_v8  ;;  %v2391_v24 = vmul.f32 0.75, %v69_v11  ;;  %v282_v60 = vrot.slane %v267_v55, 3 }
  0x2a   :  { %v275_v58 = vsel %vm92_vm1, %v274_v51, %v262_v37  ;;  %v2398_v33 = vmul.f32 0.75, %v70_v12  ;;  %v2400_v34 = vmul.f32 0.25, %v74_v61  ;;  %v2402_v37 = vmul.f32 0.25, %v75_v63 }
  0x2b   :  { %1835 = vmatpush1.bf16.msra.mxu0 %v2326_v21  ;;  %1853 = vmatpush3.bf16.msra.mxu1 %v2328_v22  ;;  %v277_v2 = vsel %vm95_vm2, %v276_v52, %v275_v58  ;;  %v2408_v11 = vmul.f32 0.75, %v71_v20  ;;  %v2410_v38 = vmul.f32 0.25, %v76_v3  ;;  %v2412_v39 = vmul.f32 0.25, %v77_v4 }
  0x2c   :  { %1855 = vmatprep.subr.bf16.mxu0 %v2215_v5  ;;  %1878 = vmatprep.subr.bf16.mxu1 %v2828_v0  ;;  %v279_v15 = vsel %vm98_vm3, %v278_v53, %v277_v2  ;;  %v2414_v40 = vmul.f32 0.75, %v72_v25  ;;  %v2416_v12 = vmul.f32 0.25, %v78_v26  ;;  %v610_v43 = vadd.f32 %v2381_v7, %v2384_v13 }
  0x2d   :  { %v281_v8 = vsel %vm101_vm4, %v280_v59, %v279_v15  ;;  %2853 = vst [vmem:[#allocation12_spill] sm:$0xff] %v2408_v11  ;;  %v612_v20 = vadd.f32 %v2402_v37, %v2391_v24  ;;  %v613_v51 = vadd.f32 %v2410_v38, %v2398_v33  ;;  %v775_v25 = vmul.f32 0.75, %v73_v54  ;;  %v2440_v54 = vld [vmem:[%s2823_s0 + $0x3] sm:$0x1] }
  0x2e   :  { %1476 = vmatmul.mubr.msk.f32.vlgmr.msra.gmra.mrb[0].mxu0 %vm106_vm6, %v105_v50  ;;  %1621 = vmatmul.mubr.msk.f32.vlgmr.msra.gmra.mrb[0].mxu1 %vm106_vm6, %v105_v50  ;;  %2854 = vst [vmem:[#allocation13_spill] sm:$0xff] %v2414_v40  ;;  %v611_v50 = vadd.f32 %v2400_v34, %v2389_v16  ;;  %v2431_v52 = vsel %vm104_vm5, %v282_v60, %v281_v8  ;;  %v776_v15 = vmul.f32 0.75, %v74_v61  ;;  %v778_v62 = vmul.f32 0.75, %v76_v3 }
  0x2f   :  { %1857 = vmatpush1.bf16.msra.mxu0 %v2217_v9  ;;  %1880 = vmatpush3.bf16.msra.mxu1 %v2219_v10  ;;  %v614_v53 = vadd.f32 %v2412_v39, %v2408_v11  ;;  %v615_v55 = vadd.f32 %v2416_v12, %v2414_v40  ;;  %v624_v59 = vrot.slane %v612_v20, 6  ;;  %v626_v2 = vrot.slane %v613_v51, 5 }
  0x30   :  { %1859 = vmatprep.subr.bf16.mxu0 %v2222_v14  ;;  %1881 = vmatprep.subr.bf16.mxu1 %v2828_v0  ;;  %v622_v58 = vrot.slane %v611_v50, 7  ;;  %v779_v20 = vmul.f32 0.75, %v77_v4  ;;  %v780_v51 = vmul.f32 0.75, %v78_v26  ;;  %v781_v61 = vadd.f32 %v775_v25, %v2321_v17 }
  0x31   :  { %350 = vmatprep.mubr.f32.mxu0 %v2826_v1  ;;  %1647 = vmatprep.mubr.msk.f32.mxu1 %vm2183_vm0, %v2826_v1  ;;  %v777_v1 = vmul.f32 0.75, %v75_v63  ;;  %v628_v60 = vrot.slane %v614_v53, 4  ;;  %v630_v8 = vrot.slane %v615_v55, 3  ;;  %v2450_v63 = vld [vmem:[%s2823_s0 + $0x7] sm:$0x1]  ;;  %v782_v53 = vadd.f32 %v776_v15, %v2337_v27 }
  0x32   :  { %v946_v17 = vmul.f32 0.25, %v2440_v54  ;;  %v784_v26 = vadd.f32 %v778_v62, %v2341_v31  ;;  %v2470_v27 = vld [vmem:[%s2823_s0 + $0xf] sm:$0x1] }
  0x33   :  { %1861 = vmatpush1.bf16.msra.mxu0 %v2226_v18  ;;  %1883 = vmatpush3.bf16.msra.mxu1 %v2228_v19  ;;  %v783_v55 = vadd.f32 %v777_v1, %v2339_v28  ;;  %v2475_v28 = vld [vmem:[%s2823_s0 + $0x13] sm:$0x1] }
  0x34   :  { %1863 = vmatprep.subr.bf16.mxu0 %v2232_v23  ;;  %1884 = vmatprep.subr.bf16.mxu1 %v2828_v0  ;;  %v623_v0 = vsel %vm92_vm1, %v622_v58, %v610_v43  ;;  %v2855_v43 = vmov 0.0|0.0   ;;  %v785_v58 = vadd.f32 %v779_v20, %v2347_v35  ;;  %v793_v35 = vrot.slane %v782_v53, 7 }
  0x35   :  { %v625_v50 = vsel %vm95_vm2, %v624_v59, %v623_v0  ;;  %v2460_v0 = vld [vmem:[%s2823_s0 + $0xb] sm:$0x1]  ;;  %v786_v59 = vadd.f32 %v780_v51, %v2349_v36  ;;  %v795_v36 = vrot.slane %v783_v55, 6  ;;  %v949_v53 = vmul.f32 0.25, %v2470_v27 }
  0x36   :  { %v627_v3 = vsel %vm98_vm3, %v626_v2, %v625_v50  ;;  %v2480_v2 = vld [vmem:[%s2823_s0 + $0x17] sm:$0x1]  ;;  %v797_v50 = vrot.slane %v784_v26, 5  ;;  %v948_v11 = vmul.f32 0.25, %v2460_v0  ;;  %v950_v55 = vmul.f32 0.25, %v2475_v28 }
  0x37   :  { %1865 = vmatpush1.bf16.msra.mxu0 %v2236_v29  ;;  %1886 = vmatpush3.bf16.msra.mxu1 %v2238_v30  ;;  %v629_v4 = vsel %vm101_vm4, %v628_v60, %v627_v3  ;;  %v947_v60 = vmul.f32 0.25, %v2450_v63  ;;  %v799_v3 = vrot.slane %v785_v58, 4  ;;  %v801_v40 = vrot.slane %v786_v59, 3 }
  0x38   :  { %1867 = vmatprep.subr.bf16.mxu0 %v2242_v32  ;;  %1887 = vmatprep.subr.bf16.mxu1 %v2855_v43  ;;  %v2483_v31 = vsel %vm104_vm5, %v630_v8, %v629_v4  ;;  %v794_v8 = vsel %vm92_vm1, %v793_v35, %v781_v61  ;;  %v951_v4 = vmul.f32 0.25, %v2480_v2  ;;  %v954_v58 = vadd.f32 %v948_v11, %v777_v1 }
  0x39   :  { %2856 = vst [vmem:[#allocation14_spill] sm:$0xff] %v2483_v31  ;;  %v796_v31 = vsel %vm95_vm2, %v795_v36, %v794_v8  ;;  %v953_v26 = vadd.f32 %v947_v60, %v776_v15  ;;  %v956_v32 = vadd.f32 %v950_v55, %v779_v20  ;;  %v1117_v29 = vmul.f32 0.75, %v2440_v54 }
  0x3a   :  { %v798_v59 = vsel %vm98_vm3, %v797_v50, %v796_v31  ;;  %v966_v30 = vrot.slane %v954_v58, 6  ;;  %v1118_v20 = vmul.f32 0.75, %v2450_v63  ;;  %v1121_v36 = vmul.f32 0.75, %v2475_v28 }
  0x3b   :  { %1869 = vmatpush1.bf16.msra.mxu0 %v2246_v41  ;;  %1889 = vmatpush3.bf16.msra.mxu1 %v2248_v42  ;;  %v952_v42 = vadd.f32 %v946_v17, %v775_v25  ;;  %v955_v41 = vadd.f32 %v949_v53, %v778_v62  ;;  %v800_v61 = vsel %vm101_vm4, %v799_v3, %v798_v59  ;;  %v964_v35 = vrot.slane %v953_v26, 7 }
  0x3c   :  { %1871 = vmatprep.subr.bf16.mxu0 %v2262_v46  ;;  %1890 = vmatprep.subr.bf16.mxu1 %v2855_v43  ;;  %v957_v46 = vadd.f32 %v951_v4, %v780_v51  ;;  %v2504_v1 = vsel %vm104_vm5, %v801_v40, %v800_v61  ;;  %v970_v11 = vrot.slane %v956_v32, 4  ;;  %v1119_v51 = vmul.f32 0.75, %v2460_v0 }
  0x3d   :  { %v968_v62 = vrot.slane %v955_v41, 5  ;;  %v965_v15 = vsel %vm92_vm1, %v964_v35, %v952_v42  ;;  %v1120_v17 = vmul.f32 0.75, %v2470_v27  ;;  %v1122_v60 = vmul.f32 0.75, %v2480_v2 }
  0x3e   :  { %v972_v25 = vrot.slane %v957_v46, 3  ;;  %v967_v31 = vsel %vm95_vm2, %v966_v30, %v965_v15  ;;  %v1123_v40 = vadd.f32 %v1117_v29, %v2381_v7  ;;  %v428_v41 = vmul.f32 0.25, %v2253_v44 }
  0x3f   :  { %1873 = vmatpush1.bf16.msra.mxu0 %v2282_v56  ;;  %1892 = vmatpush3.bf16.msra.mxu1 %v2284_v57  ;;  %v969_v32 = vsel %vm98_vm3, %v968_v62, %v967_v31  ;;  %v1124_v42 = vadd.f32 %v1118_v20, %v2400_v34  ;;  %v1125_v46 = vadd.f32 %v1119_v51, %v2402_v37  ;;  %v429_v34 = vmul.f32 0.25, %v2258_v45  ;;  %v2858_v62 = vld [vmem:[#allocation11_spill] sm:$0xff] }
  0x40   :  { %1875 = vmatprep.subr.bf16.mxu0 %v2305_v6  ;;  %1893 = vmatprep.subr.bf16.mxu1 %v2855_v43  ;;  %v971_v30 = vsel %vm101_vm4, %v970_v11, %v969_v32  ;;  %v1126_v29 = vadd.f32 %v1120_v17, %v2410_v38  ;;  %v1127_v44 = vadd.f32 %v1121_v36, %v2412_v39  ;;  %v427_v38 = vmul.f32 0.25, %v2267_v47  ;;  %v2861_v51 = vld [vmem:[#allocation7_spill] sm:$0xff]  ;;  %v2863_v32 = vld [vmem:[#allocation8_spill] sm:$0xff] }
  0x41   :  { %v2526_v7 = vsel %vm104_vm5, %v972_v25, %v971_v30  ;;  %v1128_v50 = vadd.f32 %v1122_v60, %v2416_v12  ;;  %v1135_v3 = vrot.slane %v1124_v42, 7  ;;  %v1137_v8 = vrot.slane %v1125_v46, 6  ;;  %v2860_v25 = vld [vmem:[#allocation6_spill] sm:$0xff]  ;;  %v2864_v42 = vld [vmem:[#allocation9_spill] sm:$0xff] }
  0x42   :  { %v1139_v37 = vrot.slane %v1126_v29, 5  ;;  %v1141_v53 = vrot.slane %v1127_v44, 4  ;;  %v440_v39 = vadd.f32 %v2389_v16, %v428_v41  ;;  %v2857_v4 = vmov 0.0   ;;  %v2865_v46 = vld [vmem:[#allocation13_spill] sm:$0xff]  ;;  %v2866_v44 = vld [vmem:[#allocation10_spill] sm:$0xff] }
  0x43   :  { %1877 = vmatpush1.bf16.msra.mxu0 %v2326_v21  ;;  %1895 = vmatpush3.bf16.msra.mxu1 %v2328_v22  ;;  %v1136_v12 = vsel %vm92_vm1, %v1135_v3, %v1123_v40  ;;  %v1143_v55 = vrot.slane %v1128_v50, 3  ;;  %v441_v16 = vadd.f32 %v2391_v24, %v429_v34  ;;  %v439_v58 = vadd.f32 %v2384_v13, %v427_v38  ;;  %v2859_v13 = vld [vmem:[#allocation5_spill] sm:$0xff]  ;;  %v2867_v34 = vld [vmem:[#allocation14_spill] sm:$0xff] }
  0x44   :  { %1897 = vmatprep.subr.bf16.mxu0 %v2215_v5  ;;  %1920 = vmatprep.subr.bf16.mxu1 %v2855_v43  ;;  %v1138_v45 = vsel %vm95_vm2, %v1137_v8, %v1136_v12  ;;  %v451_v59 = vrot.slane %v440_v39, 7  ;;  %v431_v61 = vmul.f32 0.25, %v2277_v49  ;;  %v432_v11 = vmul.f32 0.25, %v2858_v62  ;;  %v2862_v49 = vld [vmem:[#allocation12_spill] sm:$0xff] }
  0x45   :  { %v1140_v47 = vsel %vm98_vm3, %v1139_v37, %v1138_v45  ;;  %v453_v35 = vrot.slane %v441_v16, 6  ;;  %v1294_v20 = vrot.slane %v2450_v63, 7  ;;  %v1296_v31 = vrot.slane %v2460_v0, 6 }
  0x46   :  { %1478 = vmatmul.mubr.msk.f32.vlgmr.msra.gmra.mrb[2].mxu0 %vm106_vm6, %v2431_v52  ;;  %1648 = vmatmul.mubr.msk.f32.vlgmr.msra.gmra.mrb[2].mxu1 %vm106_vm6, %v2431_v52  ;;  %v430_v52 = vmul.f32 0.25, %v2272_v48  ;;  %v1142_v26 = vsel %vm101_vm4, %v1141_v53, %v1140_v47  ;;  %v452_v15 = vsel %vm92_vm1, %v451_v59, %v439_v58  ;;  %v443_v17 = vadd.f32 %v2862_v49, %v431_v61 }
  0x47   :  { %1899 = vmatpush1.bf16.msra.mxu0 %v2217_v9  ;;  %1922 = vmatpush3.bf16.msra.mxu1 %v2219_v10  ;;  %v2553_v48 = vsel %vm104_vm5, %v1143_v55, %v1142_v26  ;;  %v1295_v36 = vsel %vm92_vm1, %v1294_v20, %v2440_v54  ;;  %v1298_v60 = vrot.slane %v2470_v27, 5  ;;  %v454_v40 = vsel %vm95_vm2, %v453_v35, %v452_v15 }
  0x48   :  { %1901 = vmatprep.subr.bf16.mxu0 %v2222_v14  ;;  %1923 = vmatprep.subr.bf16.mxu1 %v2855_v43  ;;  %v442_v24 = vadd.f32 %v2398_v33, %v430_v52  ;;  %v1297_v41 = vsel %vm95_vm2, %v1296_v31, %v1295_v36  ;;  %v1300_v63 = vrot.slane %v2475_v28, 4  ;;  %v444_v30 = vadd.f32 %v2865_v46, %v432_v11 }
  0x49   :  { %527 = vmatprep.mubr.f32.mxu0 %v2857_v4  ;;  %1674 = vmatprep.mubr.msk.f32.mxu1 %vm2183_vm0, %v2857_v4  ;;  %v1299_v0 = vsel %vm98_vm3, %v1298_v60, %v1297_v41  ;;  %v1302_v29 = vrot.slane %v2480_v2, 3  ;;  %v457_v54 = vrot.slane %v443_v17, 4 }
  0x4a   :  { %v455_v33 = vrot.slane %v442_v24, 5  ;;  %v1301_v27 = vsel %vm101_vm4, %v1300_v63, %v1299_v0  ;;  %v459_v3 = vrot.slane %v444_v30, 3 }
  0x4b   :  { %1903 = vmatpush1.bf16.msra.mxu0 %v2226_v18  ;;  %1925 = vmatpush3.bf16.msra.mxu1 %v2228_v19  ;;  %v2584_v28 = vsel %vm104_vm5, %v1302_v29, %v1301_v27 }
  0x4c   :  { %1905 = vmatprep.subr.bf16.mxu0 %v2232_v23  ;;  %1926 = vmatprep.subr.bf16.mxu1 %v2855_v43  ;;  %v456_v50 = vsel %vm98_vm3, %v455_v33, %v454_v40 }
  0x4d   :  { %v458_v2 = vsel %vm101_vm4, %v457_v54, %v456_v50 }
  0x4e   :  { %v460_v8 = vsel %vm104_vm5, %v459_v3, %v458_v2 }
  0x4f   :  { %1907 = vmatpush1.bf16.msra.mxu0 %v2859_v13  ;;  %1928 = vmatpush3.bf16.msra.mxu1 %v2860_v25 }
  0x50   :  { %1909 = vmatprep.subr.bf16.mxu0 %v2861_v51  ;;  %1929 = vmatprep.subr.bf16.mxu1 %v2855_v43 }
  0x53   :  { %1911 = vmatpush1.bf16.msra.mxu0 %v2863_v32  ;;  %1931 = vmatpush3.bf16.msra.mxu1 %v2864_v42 }
  0x54   :  { %1913 = vmatprep.subr.bf16.mxu0 %v2866_v44  ;;  %1932 = vmatprep.subr.bf16.mxu1 %v2855_v43 }
  0x57   :  { %1915 = vmatpush1.bf16.msra.mxu0 %v2282_v56  ;;  %1934 = vmatpush3.bf16.msra.mxu1 %v2284_v57 }
  0x58   :  { %1917 = vmatprep.subr.bf16.mxu0 %v2305_v6  ;;  %1935 = vmatprep.subr.bf16.mxu1 %v2855_v43 }
  0x5b   :  { %1919 = vmatpush1.bf16.msra.mxu0 %v2326_v21  ;;  %1937 = vmatpush3.bf16.msra.mxu1 %v2328_v22 }
  0x5c   :  { %1939 = vmatprep.subr.bf16.mxu0 %v2215_v5  ;;  %1962 = vmatprep.subr.bf16.mxu1 %v2855_v43 }
  0x5e   :  { %1480 = vmatmul.mubr.msk.f32.vlgmr.msra.gmra.mrb[4].mxu0 %vm106_vm6, %v460_v8  ;;  %1675 = vmatmul.mubr.msk.f32.vlgmr.msra.gmra.mrb[4].mxu1 %vm106_vm6, %v460_v8 }
  0x5f   :  { %1941 = vmatpush1.bf16.msra.mxu0 %v2217_v9  ;;  %1964 = vmatpush3.bf16.msra.mxu1 %v2219_v10 }
  0x60   :  { %1943 = vmatprep.subr.bf16.mxu0 %v2222_v14  ;;  %1965 = vmatprep.subr.bf16.mxu1 %v2855_v43 }
  0x61   :  { %698 = vmatprep.mubr.f32.mxu0 %v2857_v4  ;;  %1701 = vmatprep.mubr.msk.f32.mxu1 %vm2183_vm0, %v2857_v4 }
  0x63   :  { %1945 = vmatpush1.bf16.msra.mxu0 %v2226_v18  ;;  %1967 = vmatpush3.bf16.msra.mxu1 %v2228_v19 }
  0x64   :  { %1947 = vmatprep.subr.bf16.mxu0 %v2232_v23  ;;  %1968 = vmatprep.subr.bf16.mxu1 %v2855_v43 }
  0x67   :  { %1949 = vmatpush1.bf16.msra.mxu0 %v2859_v13  ;;  %1970 = vmatpush3.bf16.msra.mxu1 %v2860_v25 }
  0x68   :  { %1951 = vmatprep.subr.bf16.mxu0 %v2861_v51  ;;  %1971 = vmatprep.subr.bf16.mxu1 %v2855_v43 }
  0x6b   :  { %1953 = vmatpush1.bf16.msra.mxu0 %v2863_v32  ;;  %1973 = vmatpush3.bf16.msra.mxu1 %v2864_v42 }
  0x6c   :  { %1955 = vmatprep.subr.bf16.mxu0 %v2866_v44  ;;  %1974 = vmatprep.subr.bf16.mxu1 %v2855_v43 }
  0x6f   :  { %1957 = vmatpush1.bf16.msra.mxu0 %v2282_v56  ;;  %1976 = vmatpush3.bf16.msra.mxu1 %v2284_v57 }
  0x70   :  { %1959 = vmatprep.subr.bf16.mxu0 %v2305_v6  ;;  %1977 = vmatprep.subr.bf16.mxu1 %v2855_v43 }
  0x73   :  { %1961 = vmatpush1.bf16.msra.mxu0 %v2326_v21  ;;  %1979 = vmatpush3.bf16.msra.mxu1 %v2328_v22 }
  0x74   :  { %1981 = vmatprep.subr.bf16.mxu0 %v2215_v5  ;;  %2004 = vmatprep.subr.bf16.mxu1 %v2855_v43 }
  0x76   :  { %1482 = vmatmul.mubr.msk.f32.vlgmr.msra.gmra.mrb[6].mxu0 %vm106_vm6, %v2867_v34  ;;  %1702 = vmatmul.mubr.msk.f32.vlgmr.msra.gmra.mrb[6].mxu1 %vm106_vm6, %v2867_v34 }
  0x77   :  { %1983 = vmatpush1.bf16.msra.mxu0 %v2217_v9  ;;  %2006 = vmatpush3.bf16.msra.mxu1 %v2219_v10 }
  0x78   :  { %1985 = vmatprep.subr.bf16.mxu0 %v2222_v14  ;;  %2007 = vmatprep.subr.bf16.mxu1 %v2855_v43 }
  0x79   :  { %869 = vmatprep.mubr.f32.mxu0 %v2857_v4  ;;  %1728 = vmatprep.mubr.msk.f32.mxu1 %vm2183_vm0, %v2857_v4 }
  0x7b   :  { %1987 = vmatpush1.bf16.msra.mxu0 %v2226_v18  ;;  %2009 = vmatpush3.bf16.msra.mxu1 %v2228_v19 }
  0x7c   :  { %1989 = vmatprep.subr.bf16.mxu0 %v2232_v23  ;;  %2010 = vmatprep.subr.bf16.mxu1 %v2855_v43 }
  0x7f   :  { %1991 = vmatpush1.bf16.msra.mxu0 %v2859_v13  ;;  %2012 = vmatpush3.bf16.msra.mxu1 %v2860_v25 }
  0x80   :  { %1993 = vmatprep.subr.bf16.mxu0 %v2861_v51  ;;  %2013 = vmatprep.subr.bf16.mxu1 %v2855_v43 }
  0x83   :  { %1995 = vmatpush1.bf16.msra.mxu0 %v2863_v32  ;;  %2015 = vmatpush3.bf16.msra.mxu1 %v2864_v42 }
  0x84   :  { %1997 = vmatprep.subr.bf16.mxu0 %v2866_v44  ;;  %2016 = vmatprep.subr.bf16.mxu1 %v2855_v43 }
  0x87   :  { %1999 = vmatpush1.bf16.msra.mxu0 %v2282_v56  ;;  %2018 = vmatpush3.bf16.msra.mxu1 %v2284_v57 }
  0x88   :  { %2001 = vmatprep.subr.bf16.mxu0 %v2305_v6  ;;  %2019 = vmatprep.subr.bf16.mxu1 %v2855_v43 }
  0x8b   :  { %2003 = vmatpush1.bf16.msra.mxu0 %v2326_v21  ;;  %2021 = vmatpush3.bf16.msra.mxu1 %v2328_v22 }
  0x8c   :  { %2023 = vmatprep.subr.bf16.mxu0 %v2215_v5  ;;  %2046 = vmatprep.subr.bf16.mxu1 %v2855_v43 }
  0x8e   :  { %1484 = vmatmul.mubr.msk.f32.vlgmr.msra.gmra.mrb[8].mxu0 %vm106_vm6, %v2504_v1  ;;  %1729 = vmatmul.mubr.msk.f32.vlgmr.msra.gmra.mrb[8].mxu1 %vm106_vm6, %v2504_v1 }
  0x8f   :  { %2025 = vmatpush1.bf16.msra.mxu0 %v2217_v9  ;;  %2048 = vmatpush3.bf16.msra.mxu1 %v2219_v10 }
  0x90   :  { %2027 = vmatprep.subr.bf16.mxu0 %v2222_v14  ;;  %2049 = vmatprep.subr.bf16.mxu1 %v2855_v43 }
  0x91   :  { %1040 = vmatprep.mubr.f32.mxu0 %v2857_v4  ;;  %1755 = vmatprep.mubr.msk.f32.mxu1 %vm2183_vm0, %v2857_v4 }
  0x93   :  { %2029 = vmatpush1.bf16.msra.mxu0 %v2226_v18  ;;  %2051 = vmatpush3.bf16.msra.mxu1 %v2228_v19 }
  0x94   :  { %2031 = vmatprep.subr.bf16.mxu0 %v2232_v23  ;;  %2052 = vmatprep.subr.bf16.mxu1 %v2855_v43 }
  0x97   :  { %2033 = vmatpush1.bf16.msra.mxu0 %v2859_v13  ;;  %2054 = vmatpush3.bf16.msra.mxu1 %v2860_v25 }
  0x98   :  { %2035 = vmatprep.subr.bf16.mxu0 %v2861_v51  ;;  %2055 = vmatprep.subr.bf16.mxu1 %v2855_v43 }
  0x9b   :  { %2037 = vmatpush1.bf16.msra.mxu0 %v2863_v32  ;;  %2057 = vmatpush3.bf16.msra.mxu1 %v2864_v42 }
  0x9c   :  { %2039 = vmatprep.subr.bf16.mxu0 %v2866_v44  ;;  %2058 = vmatprep.subr.bf16.mxu1 %v2855_v43 }
  0x9f   :  { %2041 = vmatpush1.bf16.msra.mxu0 %v2282_v56  ;;  %2060 = vmatpush3.bf16.msra.mxu1 %v2284_v57 }
  0xa0   :  { %2043 = vmatprep.subr.bf16.mxu0 %v2305_v6  ;;  %2061 = vmatprep.subr.bf16.mxu1 %v2855_v43 }
  0xa3   :  { %2045 = vmatpush1.bf16.msra.mxu0 %v2326_v21  ;;  %2063 = vmatpush3.bf16.msra.mxu1 %v2328_v22 }
  0xa4   :  { %2065 = vmatprep.subr.bf16.mxu0 %v2215_v5  ;;  %2088 = vmatprep.subr.bf16.mxu1 %v2855_v43 }
  0xa6   :  { %1486 = vmatmul.mubr.msk.f32.vlgmr.msra.gmra.mrb[10].mxu0 %vm106_vm6, %v2526_v7  ;;  %1756 = vmatmul.mubr.msk.f32.vlgmr.msra.gmra.mrb[10].mxu1 %vm106_vm6, %v2526_v7 }
  0xa7   :  { %2067 = vmatpush1.bf16.msra.mxu0 %v2217_v9  ;;  %2090 = vmatpush3.bf16.msra.mxu1 %v2219_v10 }
  0xa8   :  { %2069 = vmatprep.subr.bf16.mxu0 %v2222_v14  ;;  %2091 = vmatprep.subr.bf16.mxu1 %v2855_v43 }
  0xa9   :  { %1211 = vmatprep.mubr.f32.mxu0 %v2857_v4  ;;  %1782 = vmatprep.mubr.msk.f32.mxu1 %vm2183_vm0, %v2857_v4 }
  0xab   :  { %2071 = vmatpush1.bf16.msra.mxu0 %v2226_v18  ;;  %2093 = vmatpush3.bf16.msra.mxu1 %v2228_v19 }
  0xac   :  { %2073 = vmatprep.subr.bf16.mxu0 %v2232_v23  ;;  %2094 = vmatprep.subr.bf16.mxu1 %v2855_v43 }
  0xaf   :  { %2075 = vmatpush1.bf16.msra.mxu0 %v2859_v13  ;;  %2096 = vmatpush3.bf16.msra.mxu1 %v2860_v25 }
  0xb0   :  { %2077 = vmatprep.subr.bf16.mxu0 %v2861_v51  ;;  %2097 = vmatprep.subr.bf16.mxu1 %v2855_v43 }
  0xb3   :  { %2079 = vmatpush1.bf16.msra.mxu0 %v2863_v32  ;;  %2099 = vmatpush3.bf16.msra.mxu1 %v2864_v42 }
  0xb4   :  { %2081 = vmatprep.subr.bf16.mxu0 %v2866_v44  ;;  %2100 = vmatprep.subr.bf16.mxu1 %v2855_v43 }
  0xb7   :  { %2083 = vmatpush1.bf16.msra.mxu0 %v2282_v56  ;;  %2102 = vmatpush3.bf16.msra.mxu1 %v2284_v57 }
  0xb8   :  { %2085 = vmatprep.subr.bf16.mxu0 %v2305_v6  ;;  %2103 = vmatprep.subr.bf16.mxu1 %v2855_v43 }
  0xbb   :  { %2087 = vmatpush1.bf16.msra.mxu0 %v2326_v21  ;;  %2105 = vmatpush3.bf16.msra.mxu1 %v2328_v22 }
  0xbc   :  { %2107 = vmatprep.subr.bf16.mxu0 %v2215_v5  ;;  %2130 = vmatprep.subr.bf16.mxu1 %v2855_v43 }
  0xbe   :  { %1488 = vmatmul.mubr.msk.f32.vlgmr.msra.gmra.mrb[12].mxu0 %vm106_vm6, %v2553_v48  ;;  %1783 = vmatmul.mubr.msk.f32.vlgmr.msra.gmra.mrb[12].mxu1 %vm106_vm6, %v2553_v48 }
  0xbf   :  { %2109 = vmatpush1.bf16.msra.mxu0 %v2217_v9  ;;  %2132 = vmatpush3.bf16.msra.mxu1 %v2219_v10 }
  0xc0   :  { %2111 = vmatprep.subr.bf16.mxu0 %v2222_v14  ;;  %2133 = vmatprep.subr.bf16.mxu1 %v2855_v43 }
  0xc1   :  { %1370 = vmatprep.mubr.f32.mxu0 %v2857_v4  ;;  %1809 = vmatprep.mubr.msk.f32.mxu1 %vm2183_vm0, %v2857_v4 }
  0xc3   :  { %2113 = vmatpush1.bf16.msra.mxu0 %v2226_v18  ;;  %2135 = vmatpush3.bf16.msra.mxu1 %v2228_v19 }
  0xc4   :  { %2115 = vmatprep.subr.bf16.mxu0 %v2232_v23  ;;  %2136 = vmatprep.subr.bf16.mxu1 %v2855_v43 }
  0xc7   :  { %2117 = vmatpush1.bf16.msra.mxu0 %v2859_v13  ;;  %2138 = vmatpush3.bf16.msra.mxu1 %v2860_v25 }
  0xc8   :  { %2119 = vmatprep.subr.bf16.mxu0 %v2861_v51  ;;  %2139 = vmatprep.subr.bf16.mxu1 %v2855_v43 }
  0xcb   :  { %2121 = vmatpush1.bf16.msra.mxu0 %v2863_v32  ;;  %2141 = vmatpush3.bf16.msra.mxu1 %v2864_v42 }
  0xcc   :  { %2123 = vmatprep.subr.bf16.mxu0 %v2866_v44  ;;  %2142 = vmatprep.subr.bf16.mxu1 %v2855_v43 }
  0xcf   :  { %2125 = vmatpush1.bf16.msra.mxu0 %v2282_v56  ;;  %2144 = vmatpush3.bf16.msra.mxu1 %v2284_v57 }
  0xd0   :  { %2127 = vmatprep.subr.bf16.mxu0 %v2305_v6  ;;  %2145 = vmatprep.subr.bf16.mxu1 %v2855_v43 }
  0xd3   :  { %2129 = vmatpush1.bf16.msra.mxu0 %v2326_v21  ;;  %2147 = vmatpush3.bf16.msra.mxu1 %v2328_v22 }
  0xd6   :  { %1490 = vmatmul.mubr.msk.f32.vlgmr.msra.gmra.mrb[14].mxu0 %vm106_vm6, %v2584_v28  ;;  %1810 = vmatmul.mubr.msk.f32.vlgmr.msra.gmra.mrb[14].mxu1 %vm106_vm6, %v2584_v28 }
 0x101   :  { %v175_v5 = vpop.f32.mrb[0].mxu0  ;;  %v246_v9 = vpop.f32.mrb[0].mxu1 }
 0x102   :  { %1447 = vst [vmem:[%s2825_s2] sm:$0x3f] %v175_v5  ;;  %v177_v10 = vpop.f32.mrb[1].mxu0  ;;  %1449 = vst [vmem:[%s2825_s2 + $0x10] sm:$0x3f] %v246_v9  ;;  %v1622_v14 = vpop.f32.mrb[1].mxu1 }
 0x103   :  { %1448 = vst [vmem:[%s2825_s2 + $0x8] sm:$0x3f] %v177_v10 }
 0x119   :  { %v352_v18 = vpop.f32.mrb[2].mxu0  ;;  %v423_v19 = vpop.f32.mrb[2].mxu1 }
 0x11a   :  { %1450 = vst [vmem:[%s2825_s2 + $0x18] sm:$0x3f] %v352_v18  ;;  %v354_v23 = vpop.f32.mrb[3].mxu0  ;;  %1452 = vst [vmem:[%s2825_s2 + $0x28] sm:$0x3f] %v423_v19  ;;  %v1649_v56 = vpop.f32.mrb[3].mxu1 }
 0x11b   :  { %1451 = vst [vmem:[%s2825_s2 + $0x20] sm:$0x3f] %v354_v23 }
 0x131   :  { %v529_v57 = vpop.f32.mrb[4].mxu0  ;;  %v600_v6 = vpop.f32.mrb[4].mxu1 }
 0x132   :  { %1453 = vst [vmem:[%s2825_s2 + $0x30] sm:$0x3f] %v529_v57  ;;  %v531_v21 = vpop.f32.mrb[5].mxu0  ;;  %1455 = vst [vmem:[%s2825_s2 + $0x40] sm:$0x3f] %v600_v6  ;;  %v1676_v22 = vpop.f32.mrb[5].mxu1 }
 0x133   :  { %1454 = vst [vmem:[%s2825_s2 + $0x38] sm:$0x3f] %v531_v21 }
 0x149   :  { %v700_v43 = vpop.f32.mrb[6].mxu0  ;;  %v771_v1 = vpop.f32.mrb[6].mxu1 }
 0x14a   :  { %1456 = vst [vmem:[%s2825_s2 + $0x48] sm:$0x3f] %v700_v43  ;;  %v702_v7 = vpop.f32.mrb[7].mxu0  ;;  %1458 = vst [vmem:[%s2825_s2 + $0x58] sm:$0x3f] %v771_v1  ;;  %v1703_v37 = vpop.f32.mrb[7].mxu1 }
 0x14b   :  { %1457 = vst [vmem:[%s2825_s2 + $0x50] sm:$0x3f] %v702_v7 }
 0x161   :  { %v871_v53 = vpop.f32.mrb[8].mxu0  ;;  %v942_v38 = vpop.f32.mrb[8].mxu1 }
 0x162   :  { %1459 = vst [vmem:[%s2825_s2 + $0x60] sm:$0x3f] %v871_v53  ;;  %v873_v39 = vpop.f32.mrb[9].mxu0  ;;  %1461 = vst [vmem:[%s2825_s2 + $0x70] sm:$0x3f] %v942_v38  ;;  %v1730_v12 = vpop.f32.mrb[9].mxu1 }
 0x163   :  { %1460 = vst [vmem:[%s2825_s2 + $0x68] sm:$0x3f] %v873_v39 }
 0x179   :  { %v1042_v55 = vpop.f32.mrb[10].mxu0  ;;  %v1113_v45 = vpop.f32.mrb[10].mxu1 }
 0x17a   :  { %1462 = vst [vmem:[%s2825_s2 + $0x78] sm:$0x3f] %v1042_v55  ;;  %v1044_v52 = vpop.f32.mrb[11].mxu0  ;;  %1464 = vst [vmem:[%s2825_s2 + $0x88] sm:$0x3f] %v1113_v45  ;;  %v1757_v4 = vpop.f32.mrb[11].mxu1 }
 0x17b   :  { %1463 = vst [vmem:[%s2825_s2 + $0x80] sm:$0x3f] %v1044_v52 }
 0x191   :  { %v1213_v47 = vpop.f32.mrb[12].mxu0  ;;  %v1284_v16 = vpop.f32.mrb[12].mxu1 }
 0x192   :  { %1465 = vst [vmem:[%s2825_s2 + $0x90] sm:$0x3f] %v1213_v47  ;;  %v1215_v26 = vpop.f32.mrb[13].mxu0  ;;  %1467 = vst [vmem:[%s2825_s2 + $0xa0] sm:$0x3f] %v1284_v16  ;;  %v1784_v58 = vpop.f32.mrb[13].mxu1 }
 0x193   :  { %1466 = vst [vmem:[%s2825_s2 + $0x98] sm:$0x3f] %v1215_v26 }
 0x1a9   :  { %v1372_v59 = vpop.f32.mrb[14].mxu0  ;;  %v1443_v48 = vpop.f32.mrb[14].mxu1 }
 0x1aa   :  { %1468 = vst [vmem:[%s2825_s2 + $0xa8] sm:$0x3f] %v1372_v59  ;;  %1470 = vst [vmem:[%s2825_s2 + $0xb8] sm:$0x3f] %v1443_v48  ;;  %v1374_v61 = vpop.f32.mrb[15].mxu0  ;;  %v1811_v24 = vpop.f32.mrb[15].mxu1 }
 0x1ab   :  { %1469 = vst [vmem:[%s2825_s2 + $0xb0] sm:$0x3f] %v1374_v61 }
 0x1ac   :  { %1475 = vsyncpa [#allocation3], 1 }

// kernel: custom-call.2
= control target key start
LH: loop header
LB: loop body
LE: loop exit
PB: predicated region body
PF: predicated region fallthrough
CT: control target
= control target key end

     0   :  { %s126_s0 = inlined_call_operand.vmem [shape: f32[2,3,8,12,16], index: 0, kind: input, shape index: {}]   ;;  %s127_s1 = inlined_call_operand.vmem [shape: f32[2,3,8,12,16], index: 1, kind: input, shape index: {}]   ;;  %s128_s2 = inlined_call_operand.hbm [shape: c64[2,3,8,12,16], index: 2, kind: output, shape index: {}]  }
   0x1   :  { %s87_s11 = scalar_lea.hbm %s128_s2, 9216 }
   0x2   :  { %4 = vsyncpa [#allocation0], 0  ;;  %s5_s14 = sshll.u32 %s126_s0, 4  ;;  %s6_s14 = int_to_ptr.vmem [resolvable:$true] %s5_s14 }
   0x3   :  { %s18_s15 = scalar_lea.vmem %s6_s14, 9216  ;;  %p23_p1 = scmp.lt.s32.totalorder %s6_s14, %s6_s14 }
   0x4   :  { %p19_p0 = scmp.ne.s32.totalorder %s6_s14, %s18_s15  ;;  %p24_p2 = scmp.lt.s32.totalorder %s18_s15, %s18_s15 }
   0x6   :  { %p25_p3 = por %p24_p2, %p23_p1 }
   0x8   :  { %p26_p4 = pnand %p25_p3, %p19_p0 }
   0xa   :  { %29 = shalt.err (!%p26_p4)  }
   0xb   :  { %p31_p5 = scmp.ne.s32.totalorder %s128_s2, %s87_s11  ;;  %s32_s0 = scalar_lea.hbm %s128_s2, 18432 }
   0xc   :  { %p33_p6 = scmp.lt.u32.totalorder %s32_s0, %s87_s11  ;;  %p34_p7 = scmp.lt.u32.totalorder %s87_s11, %s128_s2 }
   0xe   :  { %p35_p8 = por %p34_p7, %p33_p6 }
  0x10   :  { %p36_p9 = pnand %p35_p8, %p31_p5 }
  0x12   :  { %39 = shalt.err (!%p36_p9)  }
  0x13   :  { %8 = dma.vmem_to_hbm [thread:$0]  %s6_s14, 9216, %s128_s2, [#allocation0] }
  0x14   :  { %65 = dma.done.wait [#allocation0], 9216  }
  0x15   :  { %66 = vsyncadd [#allocation0], 4294958080 }
  0x16   :  { %10 = vsyncpa [#allocation0], 1 }
  0x17   :  { %11 = vsyncpa [#allocation1], 0  ;;  %s12_s28 = sshll.u32 %s127_s1, 4  ;;  %s13_s28 = int_to_ptr.vmem [resolvable:$true] %s12_s28 }
  0x18   :  { %s40_s29 = scalar_lea.vmem %s13_s28, 9216  ;;  %p45_p11 = scmp.lt.s32.totalorder %s13_s28, %s13_s28 }
  0x19   :  { %p41_p10 = scmp.ne.s32.totalorder %s13_s28, %s40_s29  ;;  %p46_p12 = scmp.lt.s32.totalorder %s40_s29, %s40_s29 }
  0x1b   :  { %p47_p13 = por %p46_p12, %p45_p11 }
  0x1d   :  { %p48_p0 = pnand %p47_p13, %p41_p10 }
  0x1f   :  { %51 = shalt.err (!%p48_p0)  }
  0x20   :  { %p53_p1 = scmp.ne.s32.totalorder %s87_s11, %s32_s0  ;;  %p56_p2 = scmp.lt.u32.totalorder %s32_s0, %s32_s0 }
  0x22   :  { %p57_p3 = por %p56_p2, %p34_p7 }
  0x24   :  { %p59_p4 = por %p57_p3, %p33_p6 }
  0x26   :  { %p60_p5 = pnand %p59_p4, %p53_p1 }
  0x28   :  { %63 = shalt.err (!%p60_p5)  }
  0x29   :  { %15 = dma.vmem_to_hbm [thread:$0]  %s13_s28, 9216, %s87_s11, [#allocation1] }
  0x2a   :  { %67 = dma.done.wait [#allocation1], 9216  }
  0x2b   :  { %68 = vsyncadd [#allocation1], 4294958080 }
  0x2c   :  { %17 = vsyncpa [#allocation1], 1 }

</bundles_post_ra>
